<compile_context>
chip_gen: v7x
topology: tpu7x:2x2x1
jax: 0.10.0
libtpu: 0.0.40
codegen_flags: <defaults>
</compile_context>

<pallas_src>
import functools

import jax
import jax.numpy as jnp
from jax import lax
from jax.experimental import pallas as pl
from jax.experimental.pallas import tpu as pltpu


# ----------------------------------------------------------------------------
# Kernel 1: forward loss only (exact equivalent of module.forward()).
# ----------------------------------------------------------------------------
def rosenbrock_kernel(theta_ref, out_ref):
    # theta_ref: SMEM f32[2] -> (x, y)
    # out_ref:   SMEM f32[1] -> scalar loss
    x = theta_ref[0]
    y = theta_ref[1]
    one_minus_x = 1.0 - x
    resid = y - x * x
    out_ref[0] = one_minus_x * one_minus_x + 100.0 * (resid * resid)


def rosenbrock_loss(theta: jax.Array) -> jax.Array:
    """theta: f32[2] -> scalar f32 Rosenbrock loss (matches module.forward())."""
    out = pl.pallas_call(
        rosenbrock_kernel,
        out_shape=jax.ShapeDtypeStruct((1,), jnp.float32),
        in_specs=[pl.BlockSpec(memory_space=pltpu.SMEM)],
        out_specs=pl.BlockSpec(memory_space=pltpu.SMEM),
        # ~6 scalar FLOPs, 8 bytes read + 4 bytes written.
        cost_estimate=pl.CostEstimate(flops=6, transcendentals=0, bytes_accessed=12),
    )(theta)
    # Metadata-only reshape to scalar; avoids an extra tiny XLA slice op.
    return out.reshape(())


# ----------------------------------------------------------------------------
# Kernel 2: loss + analytic gradient in the same launch.
# ----------------------------------------------------------------------------
def rosenbrock_loss_grad_kernel(theta_ref, loss_ref, grad_ref):
    # theta_ref: SMEM f32[2]; loss_ref: SMEM f32[1]; grad_ref: SMEM f32[2]
    x = theta_ref[0]
    y = theta_ref[1]
    one_minus_x = 1.0 - x
    resid = y - x * x
    loss_ref[0] = one_minus_x * one_minus_x + 100.0 * (resid * resid)
    grad_ref[0] = -2.0 * one_minus_x - 400.0 * x * resid
    grad_ref[1] = 200.0 * resid


def rosenbrock_loss_and_grad(theta: jax.Array):
    """theta: f32[2] -> (scalar loss, f32[2] analytic gradient), one launch."""
    loss, grad = pl.pallas_call(
        rosenbrock_loss_grad_kernel,
        out_shape=(
            jax.ShapeDtypeStruct((1,), jnp.float32),
            jax.ShapeDtypeStruct((2,), jnp.float32),
        ),
        in_specs=[pl.BlockSpec(memory_space=pltpu.SMEM)],
        out_specs=(
            pl.BlockSpec(memory_space=pltpu.SMEM),
            pl.BlockSpec(memory_space=pltpu.SMEM),
        ),
        cost_estimate=pl.CostEstimate(flops=12, transcendentals=0, bytes_accessed=20),
    )(theta)
    return loss.reshape(()), grad


# ----------------------------------------------------------------------------
# Kernel 3: fused optimization loop — loss + grad + GD update + iteration loop
# in a single kernel launch (N steps -> 1 launch).
# ----------------------------------------------------------------------------
def rosenbrock_gd_kernel(theta_ref, theta_out_ref, loss_ref, *, num_steps, lr):
    x0 = theta_ref[0]
    y0 = theta_ref[1]

    def body(_, carry):
        x, y = carry
        resid = y - x * x
        gx = -2.0 * (1.0 - x) - 400.0 * x * resid
        gy = 200.0 * resid
        return (x - lr * gx, y - lr * gy)

    x, y = lax.fori_loop(0, num_steps, body, (x0, y0))

    theta_out_ref[0] = x
    theta_out_ref[1] = y
    one_minus_x = 1.0 - x
    resid = y - x * x
    loss_ref[0] = one_minus_x * one_minus_x + 100.0 * (resid * resid)


def rosenbrock_optimize(theta: jax.Array, num_steps: int, lr: float):
    """Run `num_steps` of scalar gradient descent on the Rosenbrock loss in a
    single Pallas launch. Returns (theta_final f32[2], final scalar loss)."""
    kernel = functools.partial(rosenbrock_gd_kernel, num_steps=num_steps, lr=lr)
    theta_out, loss = pl.pallas_call(
        kernel,
        out_shape=(
            jax.ShapeDtypeStruct((2,), jnp.float32),
            jax.ShapeDtypeStruct((1,), jnp.float32),
        ),
        in_specs=[pl.BlockSpec(memory_space=pltpu.SMEM)],
        out_specs=(
            pl.BlockSpec(memory_space=pltpu.SMEM),
            pl.BlockSpec(memory_space=pltpu.SMEM),
        ),
    )(theta)
    return theta_out, loss.reshape(())


# ----------------------------------------------------------------------------
# Pure-JAX references.
# ----------------------------------------------------------------------------
def rosenbrock_loss_ref(theta: jax.Array) -> jax.Array:
    x, y = theta[0], theta[1]
    return (1.0 - x) ** 2 + 100.0 * (y - x * x) ** 2


def rosenbrock_grad_ref(theta: jax.Array) -> jax.Array:
    x, y = theta[0], theta[1]
    resid = y - x * x
    return jnp.stack([-2.0 * (1.0 - x) - 400.0 * x * resid, 200.0 * resid])


def rosenbrock_gd_ref(theta: jax.Array, num_steps: int, lr: float):
    def body(_, carry):
        x, y = carry
        resid = y - x * x
        gx = -2.0 * (1.0 - x) - 400.0 * x * resid
        gy = 200.0 * resid
        return (x - lr * gx, y - lr * gy)

    x, y = lax.fori_loop(0, num_steps, body, (theta[0], theta[1]))
    theta_out = jnp.stack([x, y])
    return theta_out, rosenbrock_loss_ref(theta_out)


if __name__ == "__main__":
    # Deterministic parameter init mimicking np_rng.uniform(-2, 2, size=2).
    key = jax.random.PRNGKey(0)
    theta = jax.random.uniform(key, (2,), dtype=jnp.float32, minval=-2.0, maxval=2.0)

    # 1) Forward loss (module.forward()).
    loss = jax.block_until_ready(rosenbrock_loss(theta))
    ref_loss = rosenbrock_loss_ref(theta)
    assert loss.shape == (), loss.shape
    assert jnp.allclose(loss, ref_loss, rtol=1e-5, atol=1e-5), (loss, ref_loss)

    # 2) Fused loss + analytic gradient (single launch).
    loss2, grad = jax.block_until_ready(rosenbrock_loss_and_grad(theta))
    ref_grad = rosenbrock_grad_ref(theta)
    assert jnp.allclose(loss2, ref_loss, rtol=1e-5, atol=1e-5), (loss2, ref_loss)
    assert jnp.allclose(grad, ref_grad, rtol=1e-5, atol=1e-4), (grad, ref_grad)

    # 3) Fused optimization loop: 100 GD steps in one launch.
    num_steps, lr = 100, 1e-5
    theta_opt, loss_opt = jax.block_until_ready(
        rosenbrock_optimize(theta, num_steps, lr)
    )
    theta_ref_opt, loss_ref_opt = rosenbrock_gd_ref(theta, num_steps, lr)
    assert jnp.all(jnp.isfinite(theta_opt)) and jnp.isfinite(loss_opt)
    assert jnp.allclose(theta_opt, theta_ref_opt, rtol=1e-4, atol=1e-4), (
        theta_opt,
        theta_ref_opt,
    )
    assert jnp.allclose(loss_opt, loss_ref_opt, rtol=1e-4, atol=1e-4), (
        loss_opt,
        loss_ref_opt,
    )
    assert float(loss_opt) <= float(ref_loss) + 1e-6, (loss_opt, ref_loss)

    print("KERNEL_OK")
</pallas_src>

<mosaic_0001>
module attributes {stable_mosaic.version = 11 : i64} {
  func.func @rosenbrock_kernel(%arg0: memref<2xf32, #tpu.memory_space<smem>>, %arg1: memref<1xf32, #tpu.memory_space<smem>>) attributes {dimension_semantics = [], scalar_prefetch = 0 : i64, scratch_operands = 0 : i64, tpu.core_type = #tpu.core_type<tc>} {
    %c0 = arith.constant 0 : index
    %0 = memref.load %arg0[%c0] : memref<2xf32, #tpu.memory_space<smem>>
    %c1 = arith.constant 1 : index
    %1 = memref.load %arg0[%c1] : memref<2xf32, #tpu.memory_space<smem>>
    %cst = arith.constant 1.000000e+00 : f32
    %2 = arith.subf %cst, %0 : f32
    %3 = arith.mulf %0, %0 : f32
    %4 = arith.subf %1, %3 : f32
    %5 = arith.mulf %2, %2 : f32
    %6 = arith.mulf %4, %4 : f32
    %cst_0 = arith.constant 1.000000e+02 : f32
    %7 = arith.mulf %cst_0, %6 : f32
    %8 = arith.addf %5, %7 : f32
    %c0_1 = arith.constant 0 : index
    %9 = memref.load %arg1[%c0_1] : memref<1xf32, #tpu.memory_space<smem>>
    memref.store %8, %arg1[%c0_1] : memref<1xf32, #tpu.memory_space<smem>>
    return
  }
}

</mosaic_0001>

<bundles_post_ra>
// kernel: tpu_custom_call.1
= control target key start
LH: loop header
LB: loop body
LE: loop exit
PB: predicated region body
PF: predicated region fallthrough
CT: control target
= control target key end

     0   :  { %6 = vsyncpa [#allocation3], 0  ;;  %s108_s0 = inlined_call_operand.hbm [shape: f32[2], index: 0, kind: input, shape index: {}]   ;;  %s109_s1 = inlined_call_operand.hbm [shape: f32[1], index: 1, kind: output, shape index: {}]  }
   0x1   :  { %7 = vsyncpa [#allocation4], 0  ;;  %s48_s8 = scalar_lea.hbm %s108_s0, 16 }
   0x2   :  { %p49_p0 = scmp.ne.s32.totalorder %s108_s0, %s48_s8  ;;  %p52_p1 = scmp.lt.u32.totalorder %s48_s8, %s108_s0 }
   0x4   :  { %p54_p2 = pnand %p52_p1, %p49_p0 }
   0x6   :  { %57 = shalt.err (!%p54_p2)
}
   0x7   :  { %s72_s13 = smov [#allocation2]  }
   0x8   :  { %15 = dma.hbm_to_smem %s108_s0, 16, %s72_s13, [#allocation3]  }
   0x9   :  { %68 = dma.done.wait [#allocation3], 16  }
   0xa   :  { %69 = vsyncadd [#allocation3], 4294967280 }
   0xb   :  { %19 = sfence }
   0xc   :  { %s20_s16 = sld [smem:[#allocation2]]  ;;  %s45_s17 = sld [smem:[#allocation2 + $0x1]] }
   0xd   :  { %s58_s27 = scalar_lea.hbm %s109_s1, 16 }
   0xe   :  { %p59_p3 = scmp.ne.s32.totalorder %s109_s1, %s58_s27  ;;  %p62_p4 = scmp.lt.u32.totalorder %s58_s27, %s109_s1 }
  0x10   :  { %p64_p5 = pnand %p62_p4, %p59_p3 }
  0x12   :  { %s22_s18 = ssub.f32 1.0, %s20_s16  ;;  %s23_s19 = smul.f32 %s20_s16, %s20_s16 }
  0x14   :  { %s24_s20 = ssub.f32 %s45_s17, %s23_s19  ;;  %s25_s21 = smul.f32 %s22_s18, %s22_s18 }
  0x16   :  { %s26_s22 = smul.f32 %s24_s20, %s24_s20 }
  0x18   :  { %s27_s23 = smul.f32 100.0, %s26_s22 }
  0x1a   :  { %s28_s24 = sadd.f32 %s27_s23, %s25_s21 }
  0x1c   :  { %30 = sst [smem:[#allocation5]] %s28_s24 }
  0x1d   :  { %67 = shalt.err (!%p64_p5)
}
  0x1e   :  { %s73_s2 = smov [#allocation5]  }
  0x1f   :  { %38 = dma.smem_to_hbm %s73_s2, 16, %s109_s1, [#allocation4]  }
  0x20   :  { %70 = dma.done.wait [#allocation4], 16  }
  0x21   :  { %71 = vsyncadd [#allocation4], 4294967280 }
  0x22   :  { %42 = sfence }
  0x23   :  { %43 = vsyncpa [#allocation3], 1 }
  0x24   :  { %44 = vsyncpa [#allocation4], 1 }

</bundles_post_ra>
